<compile_context>
chip_gen: v5e
topology: v5e:2x2
jax: 0.10.0
libtpu: 0.0.40
codegen_flags: <defaults>
</compile_context>

<pallas_src>
import functools

import jax
import jax.numpy as jnp
from jax.experimental import pallas as pl
from jax.experimental.pallas import tpu as pltpu


def _supcon_kernel(lhs_ref, rhsT_ref, lab_row_ref, lab_col_ref, pos_cnt_ref,
                   row_loss_ref, *, inv_t, exclude_pos):
    tq = lhs_ref.shape[0]
    n = rhsT_ref.shape[1]

    # (tq, D) @ (D, 2B) on the MXU; inputs may be bf16, accumulate in f32.
    sim = jnp.dot(lhs_ref[...], rhsT_ref[...],
                  preferred_element_type=jnp.float32)

    # Global max of sim/t is exactly 1/t for L2-normalized features
    # (diagonal self-similarity == 1), so shift by that constant instead of
    # doing a full-matrix reduce:  sim/t - max == (sim - 1) / t.
    logits = (sim - 1.0) * inv_t
    ex = jnp.exp(logits)

    # Rebuild masks in-register from labels + indices (no HBM mask traffic).
    lab_row = lab_row_ref[...]                       # (tq, 1) int32
    lab_col = lab_col_ref[...]                       # (1, 2B) int32
    same = lab_row == lab_col                        # (tq, 2B)
    col_idx = jax.lax.broadcasted_iota(jnp.int32, (tq, n), 1)
    row_idx = (pl.program_id(0) * tq
               + jax.lax.broadcasted_iota(jnp.int32, (tq, n), 0))
    not_diag = col_idx != row_idx
    pos_mask = jnp.logical_and(same, not_diag)

    pos_count = pos_cnt_ref[...]                     # (tq, 1) f32, precomputed
    pc_safe = jnp.maximum(pos_count, 1.0)            # guard 0/0 -> 0 contribution

    if exclude_pos:
        # neg_mask == (labels differ); pos_count + neg_count == n - 1 per row.
        neg_sum = jnp.sum(jnp.where(same, 0.0, ex), axis=1, keepdims=True)
        neg_count = (n - 1.0) - pos_count
        neg_ratio = neg_count / (n - 1.0)
        log_div = logits - jnp.log(ex + neg_sum / (neg_ratio + 1e-4) + 1e-16)
        num = jnp.sum(jnp.where(pos_mask, log_div, 0.0), axis=1, keepdims=True)
        row_loss = num / pc_safe
    else:
        # pos_mask + neg_mask == 1 - eye  =>  denom = off-diagonal rowsum(exp).
        denom = jnp.sum(jnp.where(not_diag, ex, 0.0), axis=1, keepdims=True)
        pos_logit_sum = jnp.sum(jnp.where(pos_mask, logits, 0.0),
                                axis=1, keepdims=True)
        row_loss = (pos_logit_sum
                    - pos_count * jnp.log(denom + 1e-16)) / pc_safe

    row_loss_ref[...] = row_loss


def supcon_loss1(proj_feat1, proj_feat2, *, temperature=0.07,
                 exclude_other_pos=False, target=None,
                 matmul_dtype=jnp.bfloat16, row_tile=256):
    """JAX/Pallas equivalent of SupConLoss1.forward (default or target path)."""
    assert proj_feat1.shape == proj_feat2.shape
    B, D = proj_feat1.shape
    n = 2 * B

    proj = jnp.concatenate([proj_feat1, proj_feat2], axis=0).astype(jnp.float32)
    lhs = proj.astype(matmul_dtype)                  # (2B, D) row tiles
    rhsT = proj.T.astype(matmul_dtype)               # (D, 2B) resident RHS

    # Labels: default path == eye(B) tiled => label i%B; target path == labels.
    if target is not None:
        labels = jnp.tile(jnp.asarray(target).reshape(-1).astype(jnp.int32), 2)
        eq = labels[:, None] == labels[None, :]
        pos_count = (jnp.sum(eq, axis=1).astype(jnp.float32) - 1.0)
    else:
        labels = jnp.tile(jnp.arange(B, dtype=jnp.int32), 2)
        pos_count = jnp.ones((n,), jnp.float32)
    lab_row = labels.reshape(n, 1)
    lab_col = labels.reshape(1, n)
    pos_count = pos_count.reshape(n, 1)

    # Row tile: largest nice divisor of 2B (multiple of 8), else full extent.
    tq = next((t for t in (row_tile, 256, 128, 64, 32, 16, 8)
               if t <= n and n % t == 0), n)
    grid = (n // tq,)

    kernel = functools.partial(
        _supcon_kernel,
        inv_t=1.0 / float(temperature),
        exclude_pos=bool(exclude_other_pos),
    )

    row_loss = pl.pallas_call(
        kernel,
        out_shape=jax.ShapeDtypeStruct((n, 1), jnp.float32),
        grid=grid,
        in_specs=[
            pl.BlockSpec((tq, D), lambda i: (i, 0)),   # lhs row tile
            pl.BlockSpec((D, n), lambda i: (0, 0)),    # resident projT
            pl.BlockSpec((tq, 1), lambda i: (i, 0)),   # row labels
            pl.BlockSpec((1, n), lambda i: (0, 0)),    # col labels
            pl.BlockSpec((tq, 1), lambda i: (i, 0)),   # per-row pos_count
        ],
        out_specs=pl.BlockSpec((tq, 1), lambda i: (i, 0)),
        compiler_params=pltpu.CompilerParams(
            dimension_semantics=("parallel",),
            vmem_limit_bytes=64 * 1024 * 1024,
        ),
    )(lhs, rhsT, lab_row, lab_col, pos_count)

    return -jnp.sum(row_loss) / n


def _reference_loss(f1, f2, *, temperature=0.07, exclude_other_pos=False,
                    target=None):
    """Pure-JAX f32 reference mirroring the PyTorch code."""
    B = f1.shape[0]
    if target is not None:
        t = jnp.asarray(target).reshape(-1)
        eq = (t[:, None] == t[None, :]).astype(jnp.float32)
        pos_b, neg_b = eq, 1.0 - eq
    else:
        pos_b = jnp.eye(B, dtype=jnp.float32)
        neg_b = 1.0 - pos_b
    diag = 1.0 - jnp.eye(2 * B, dtype=jnp.float32)
    pos_mask = jnp.tile(pos_b, (2, 2)) * diag
    neg_mask = jnp.tile(neg_b, (2, 2)) * diag
    proj = jnp.concatenate([f1, f2], 0).astype(jnp.float32)
    sim_logits = proj @ proj.T / temperature
    sim_logits = sim_logits - jnp.max(sim_logits)
    sim_exp = jnp.exp(sim_logits)
    pos_count = pos_mask.sum(1)
    neg_count = neg_mask.sum(1)
    pos_sum = (sim_exp * pos_mask).sum(1, keepdims=True)
    neg_sum = (sim_exp * neg_mask).sum(1, keepdims=True)
    if exclude_other_pos:
        neg_ratio = neg_count / (pos_count + neg_count)
        log_div = sim_logits - jnp.log(
            sim_exp + neg_sum / (neg_ratio + 1e-4)[:, None] + 1e-16)
    else:
        log_div = sim_logits - jnp.log(pos_sum + neg_sum + 1e-16)
    loss = (log_div * pos_mask).sum(1) / pos_count
    return -loss.mean()


if __name__ == "__main__":
    key = jax.random.PRNGKey(0)
    k1, k2 = jax.random.split(key)
    B, D = 4, 32  # small shapes: batch=4, feature dim=32

    f1 = jax.random.normal(k1, (B, D), dtype=jnp.float32)
    f2 = jax.random.normal(k2, (B, D), dtype=jnp.float32)
    # features must be L2-normalized (asserted in the PyTorch module)
    f1 = f1 / jnp.linalg.norm(f1, axis=1, keepdims=True)
    f2 = f2 / jnp.linalg.norm(f2, axis=1, keepdims=True)

    # 1) default (eye) path, f32 matmul: bit-accurate vs reference.
    loss = supcon_loss1(f1, f2, temperature=0.07, exclude_other_pos=False,
                        matmul_dtype=jnp.float32)
    loss = jax.block_until_ready(loss)
    ref = _reference_loss(f1, f2, temperature=0.07)
    assert jnp.isfinite(loss), loss
    assert jnp.allclose(loss, ref, rtol=1e-5, atol=1e-5), (loss, ref)

    # 2) exclude_other_pos=True branch, f32 matmul.
    loss_x = supcon_loss1(f1, f2, temperature=0.07, exclude_other_pos=True,
                          matmul_dtype=jnp.float32)
    ref_x = _reference_loss(f1, f2, temperature=0.07, exclude_other_pos=True)
    assert jnp.allclose(loss_x, ref_x, rtol=1e-5, atol=1e-5), (loss_x, ref_x)

    # 3) target (label) path, f32 matmul.
    target = jnp.array([0, 1, 0, 1], dtype=jnp.int32)
    loss_t = supcon_loss1(f1, f2, temperature=0.07, target=target,
                          matmul_dtype=jnp.float32)
    ref_t = _reference_loss(f1, f2, temperature=0.07, target=target)
    assert jnp.allclose(loss_t, ref_t, rtol=1e-5, atol=1e-5), (loss_t, ref_t)

    # 4) default path with the production bf16 MXU matmul (loose tolerance).
    loss_bf16 = supcon_loss1(f1, f2, temperature=0.07,
                             matmul_dtype=jnp.bfloat16)
    loss_bf16 = jax.block_until_ready(loss_bf16)
    assert jnp.isfinite(loss_bf16), loss_bf16
    assert jnp.allclose(loss_bf16, ref, rtol=5e-2, atol=5e-2), (loss_bf16, ref)

    print("KERNEL_OK")
</pallas_src>

<mosaic_0001>
module attributes {stable_mosaic.version = 11 : i64} {
  func.func @_supcon_kernel(%arg0: i32, %arg1: memref<8x32xf32, #tpu.memory_space<vmem>>, %arg2: memref<32x8xf32, #tpu.memory_space<vmem>>, %arg3: memref<8x1xi32, #tpu.memory_space<vmem>>, %arg4: memref<1x8xi32, #tpu.memory_space<vmem>>, %arg5: memref<8x1xf32, #tpu.memory_space<vmem>>, %arg6: memref<8x1xf32, #tpu.memory_space<vmem>>) attributes {dimension_semantics = [#tpu.dimension_semantics<parallel>], iteration_bounds = array<i64: 1>, scalar_prefetch = 0 : i64, scratch_operands = 0 : i64, tpu.core_type = #tpu.core_type<tc>, window_params = [{transform_indices = @transform_0, window_bounds = array<i64: 8, 32>}, {pipeline_mode = #tpu.pipeline_mode<synchronous>, transform_indices = @transform_1, window_bounds = array<i64: 32, 8>}, {transform_indices = @transform_2, window_bounds = array<i64: 8, 1>}, {pipeline_mode = #tpu.pipeline_mode<synchronous>, transform_indices = @transform_3, window_bounds = array<i64: 1, 8>}, {transform_indices = @transform_4, window_bounds = array<i64: 8, 1>}, {transform_indices = @transform_5, window_bounds = array<i64: 8, 1>}]} {
    %c0 = arith.constant 0 : index
    %c0_0 = arith.constant 0 : index
    %0 = vector.load %arg1[%c0, %c0_0] : memref<8x32xf32, #tpu.memory_space<vmem>>, vector<8x32xf32>
    %c0_1 = arith.constant 0 : index
    %c0_2 = arith.constant 0 : index
    %1 = vector.load %arg2[%c0_1, %c0_2] : memref<32x8xf32, #tpu.memory_space<vmem>>, vector<32x8xf32>
    %cst = arith.constant dense<0.000000e+00> : vector<8x8xf32>
    %2 = tpu.matmul %0, %1, %cst {dimension_numbers = #tpu.dot_dimension_numbers<[1], [0], [0], [1], [0, 0, 1, 1], [], []>} : vector<8x32xf32>, vector<32x8xf32>, vector<8x8xf32> -> vector<8x8xf32>
    %cst_3 = arith.constant 1.000000e+00 : f32
    %3 = vector.broadcast %cst_3 : f32 to vector<8x8xf32>
    %4 = arith.subf %2, %3 : vector<8x8xf32>
    %cst_4 = arith.constant 14.2857141 : f32
    %5 = vector.broadcast %cst_4 : f32 to vector<8x8xf32>
    %6 = arith.mulf %4, %5 : vector<8x8xf32>
    %7 = math.exp %6 : vector<8x8xf32>
    %c0_5 = arith.constant 0 : index
    %c0_6 = arith.constant 0 : index
    %8 = vector.load %arg3[%c0_5, %c0_6] : memref<8x1xi32, #tpu.memory_space<vmem>>, vector<8x1xi32>
    %c0_7 = arith.constant 0 : index
    %c0_8 = arith.constant 0 : index
    %9 = vector.load %arg4[%c0_7, %c0_8] : memref<1x8xi32, #tpu.memory_space<vmem>>, vector<1x8xi32>
    %10 = vector.broadcast %8 : vector<8x1xi32> to vector<8x8xi32>
    %11 = vector.broadcast %9 : vector<1x8xi32> to vector<8x8xi32>
    %12 = arith.cmpi eq, %10, %11 : vector<8x8xi32>
    %13 = tpu.iota {dimensions = array<i32: 1>} : vector<8x8xi32>
    %c8_i32 = arith.constant 8 : i32
    %14 = arith.muli %arg0, %c8_i32 : i32
    %15 = tpu.iota {dimensions = array<i32: 0>} : vector<8x8xi32>
    %16 = vector.broadcast %14 : i32 to vector<8x8xi32>
    %17 = arith.addi %16, %15 : vector<8x8xi32>
    %18 = arith.cmpi ne, %13, %17 : vector<8x8xi32>
    %19 = arith.andi %12, %18 : vector<8x8xi1>
    %c0_9 = arith.constant 0 : index
    %c0_10 = arith.constant 0 : index
    %20 = vector.load %arg5[%c0_9, %c0_10] : memref<8x1xf32, #tpu.memory_space<vmem>>, vector<8x1xf32>
    %cst_11 = arith.constant 1.000000e+00 : f32
    %21 = vector.broadcast %cst_11 : f32 to vector<8x1xf32>
    %22 = arith.maximumf %20, %21 : vector<8x1xf32>
    %cst_12 = arith.constant 0.000000e+00 : f32
    %23 = vector.broadcast %cst_12 : f32 to vector<8x8xf32>
    %24 = arith.select %18, %7, %23 : vector<8x8xi1>, vector<8x8xf32>
    %cst_13 = arith.constant dense<0.000000e+00> : vector<8xf32>
    %25 = vector.multi_reduction <add>, %24, %cst_13 [1] : vector<8x8xf32> to vector<8xf32>
    %26 = vector.shape_cast %25 : vector<8xf32> to vector<8x1xf32>
    %cst_14 = arith.constant 0.000000e+00 : f32
    %27 = vector.broadcast %cst_14 : f32 to vector<8x8xf32>
    %28 = arith.select %19, %6, %27 : vector<8x8xi1>, vector<8x8xf32>
    %cst_15 = arith.constant dense<0.000000e+00> : vector<8xf32>
    %29 = vector.multi_reduction <add>, %28, %cst_15 [1] : vector<8x8xf32> to vector<8xf32>
    %30 = vector.shape_cast %29 : vector<8xf32> to vector<8x1xf32>
    %cst_16 = arith.constant 1.000000e-16 : f32
    %31 = vector.broadcast %cst_16 : f32 to vector<8x1xf32>
    %32 = arith.addf %26, %31 : vector<8x1xf32>
    %33 = math.log %32 : vector<8x1xf32>
    %34 = arith.mulf %20, %33 : vector<8x1xf32>
    %35 = arith.subf %30, %34 : vector<8x1xf32>
    %36 = arith.divf %35, %22 : vector<8x1xf32>
    %c0_17 = arith.constant 0 : index
    %c0_18 = arith.constant 0 : index
    %37 = vector.load %arg6[%c0_17, %c0_18] : memref<8x1xf32, #tpu.memory_space<vmem>>, vector<8x1xf32>
    tpu.vector_store %arg6[%c0_17, %c0_18], %36 {strides = array<i32>} : memref<8x1xf32, #tpu.memory_space<vmem>>, vector<8x1xf32>,
    return
  }
  func.func @transform_0(%arg0: i32) -> (i32, i32) {
    %c0_i32 = arith.constant 0 : i32
    %c0_i32_0 = arith.constant 0 : i32
    return %arg0, %c0_i32 : i32, i32
  }
  func.func @transform_1(%arg0: i32) -> (i32, i32) {
    %c0_i32 = arith.constant 0 : i32
    %c0_i32_0 = arith.constant 0 : i32
    %c0_i32_1 = arith.constant 0 : i32
    return %c0_i32, %c0_i32_0 : i32, i32
  }
  func.func @transform_2(%arg0: i32) -> (i32, i32) {
    %c0_i32 = arith.constant 0 : i32
    %c0_i32_0 = arith.constant 0 : i32
    return %arg0, %c0_i32 : i32, i32
  }
  func.func @transform_3(%arg0: i32) -> (i32, i32) {
    %c0_i32 = arith.constant 0 : i32
    %c0_i32_0 = arith.constant 0 : i32
    %c0_i32_1 = arith.constant 0 : i32
    return %c0_i32, %c0_i32_0 : i32, i32
  }
  func.func @transform_4(%arg0: i32) -> (i32, i32) {
    %c0_i32 = arith.constant 0 : i32
    %c0_i32_0 = arith.constant 0 : i32
    return %arg0, %c0_i32 : i32, i32
  }
  func.func @transform_5(%arg0: i32) -> (i32, i32) {
    %c0_i32 = arith.constant 0 : i32
    %c0_i32_0 = arith.constant 0 : i32
    return %arg0, %c0_i32 : i32, i32
  }
}

</mosaic_0001>

<bundles_post_ra>
// kernel: tpu_custom_call.1
= control target key start
LH: loop header
LB: loop body
LE: loop exit
PB: predicated region body
PF: predicated region fallthrough
CT: control target
= control target key end

     0   :  { %v117_v2 = vmov 0   ;;  %vm25_vm0 = vcmask 261120   ;;  %v60_v7 = vlaneseq  ;;  %vm72_vm4 = vcmask 64512   ;;  %s175_s1 = inlined_call_operand.vmem [shape: f32[32,8], index: 1, kind: input, shape index: {}]   ;;  %s176_s2 = inlined_call_operand.vmem [shape: s32[8,1], index: 2, kind: input, shape index: {}]   ;;  %s177_s0 = inlined_call_operand.vmem [shape: f32[8,32], index: 0, kind: input, shape index: {}]   ;;  %s178_s3 = inlined_call_operand.vmem [shape: s32[1,8], index: 3, kind: input, shape index: {}]   ;;  %s179_s4 = inlined_call_operand.vmem [shape: f32[8,1], index: 4, kind: input, shape index: {}]   ;;  %s180_s5 = inlined_call_operand.vmem [shape: f32[8,1], index: 5, kind: output, shape index: {}]  }
   0x1   :  { %v24_v0 = vld [vmem:[%s175_s1 + $0x18] sm:$0xff]  ;;  %v23_v1 = vld [vmem:[%s175_s1 + $0x10] sm:$0xff]  ;;  %109 = vset.pattern.permute.xlu0 %v117_v2  ;;  %v53_v3 = vld [vmem:[%s176_s2] sm:$0xff]  ;;  %vm100_vm9 = vcmask 7168  }
   0x2   :  { %41 = vmatpush.msra.mxu0 %v24_v0  ;;  %v22_v4 = vld [vmem:[%s175_s1 + $0x8] sm:$0xff]  ;;  %56 = vperm.xlu0 %109, %v53_v3   ;;  %v21_v5 = vld [vmem:[%s175_s1] sm:$0xff]  ;;  %v61_v9 = vand.u32 127, %v60_v7  ;;  %v64_v10 = vshrl.u32 %v60_v7, 7 }
   0x3   :  { %v20_v6 = vld [vmem:[%s177_s0] sm:$0xff] }
   0x4   :  { %42 = vmatpush.msra.mxu0 %v23_v1  ;;  %v110_v8 = vld [vmem:[%s178_s3] ss:$0 sm:$0xff]  ;;  %vm67_vm1 = vcmp.ne.s32.totalorder %v61_v9, %v64_v10 }
   0x5   :  { %v69_v21 = vld [vmem:[%s179_s4] sm:$0xff] }
   0x6   :  { %43 = vmatpush.msra.mxu0 %v22_v4  ;;  %v70_v22 = vmax.f32 %v69_v21, 1.0 }
   0x8   :  { %44 = vmatpush.msra.mxu0 %v21_v5  ;;  %vm90_vm5 = vweird.f32 %v70_v22  ;;  %v96_v29 = vand.u32 2147483648, %v70_v22  ;;  %v94_v31 = vand.u32 2147483647, %v70_v22 }
   0x9   :  { %106 = vmatmul.msk.f32.vlgmr.msra.gmra.mxu0 %vm25_vm0, %v20_v6 }
   0xa   :  { %v97_v33 = vor.u32 1.1754944e-38, %v96_v29  ;;  %vm95_vm8 = vcmp.eq.f32.partialorder %v94_v31, 8.507059e+37 }
  0x74   :  { %v57_v11 = vpop.permute.xlu0 %56 }
  0x75   :  { %vm59_vm2 = vcmp.eq.s32.totalorder %v57_v11, %v110_v8 }
  0x76   :  { %vm68_vm3 = vmand %vm59_vm2, %vm67_vm1 }
  0x86   :  { %v46_v12 = vpop.f32.mrf.mxu0 }
  0x87   :  { %v107_v13 = vadd.f32 -1.0, %v46_v12 }
  0x89   :  { %v50_v14 = vmul.f32 14.285714, %v107_v13 }
  0x8b   :  { %v51_v15 = vmul.f32 1.442695, %v50_v14  ;;  %v76_v16 = vsel %vm68_vm3, %v50_v14, 0.0 }
  0x8c   :  { %v77_v17 = vsel %vm72_vm4, %v76_v16, 0.0 }
  0x8d   :  { %111 = vpow2.f32 %v51_v15  ;;  %78 = vadd.xlane.f32.xlu1 %v77_v17 }
  0x8e   :  { %113 = vrcp.f32 %v70_v22 }
  0x93   :  { %v112_v18 = vpop.eup %111 }
  0x94   :  { %v71_v19 = vsel %vm67_vm1, %v112_v18, 0.0  ;;  %v114_v23 = vpop.eup %113 }
  0x95   :  { %v73_v20 = vsel %vm72_vm4, %v71_v19, 0.0  ;;  %v86_v24 = vmul.f32 %v114_v23, %v70_v22  ;;  %vm91_vm6 = vweird.f32 %v114_v23 }
  0x96   :  { %74 = vadd.xlane.f32.xlu0 %v73_v20  ;;  %vm92_vm7 = vmor %vm90_vm5, %vm91_vm6 }
  0x97   :  { %v87_v25 = vsub.f32 1.0, %v86_v24 }
  0x99   :  { %v88_v28 = vmul.f32 %v114_v23, %v87_v25 }
  0x9b   :  { %v89_v30 = vadd.f32 %v114_v23, %v88_v28 }
  0x9d   :  { %v93_v34 = vsel %vm92_vm7, %v114_v23, %v89_v30 }
  0x9e   :  { %v98_v38 = vsel %vm95_vm8, %v97_v33, %v93_v34 }
 0x100   :  { %v79_v37 = vpop.xlane.xlu1 %78 }
 0x109   :  { %v75_v26 = vpop.xlane.xlu0 %74 }
 0x10a   :  { %v80_v27 = vadd.f32 1e-16, %v75_v26 }
 0x10c   :  { %115 = vlog2.f32 %v80_v27 }
 0x112   :  { %v116_v32 = vpop.eup %115 }
 0x113   :  { %v82_v35 = vmul.f32 0.6931472, %v116_v32 }
 0x115   :  { %v83_v36 = vmul.f32 %v82_v35, %v69_v21 }
 0x117   :  { %v84_v39 = vsub.f32 %v79_v37, %v83_v36 }
 0x119   :  { %v99_v40 = vmul.f32 %v98_v38, %v84_v39 }
 0x11b   :  { %101 = vst.msk [vmem:[%s180_s5] sm:$0xff] %vm100_vm9, %v99_v40 }

</bundles_post_ra>
